<compile_context>
chip_gen: v6e
topology: v6e:2x2x1
jax: 0.10.0
libtpu: 0.0.40
codegen_flags: <defaults>
</compile_context>

<pallas_src>
import jax
import jax.numpy as jnp
from jax import lax
from jax.experimental import pallas as pl
from jax.experimental.pallas import tpu as pltpu

_INV_SQRT2 = 0.7071067811865475244  # 1/sqrt(2); multiply instead of divide


def _round_up(x, m):
    return ((x + m - 1) // m) * m


def _vmem_capacity_bytes():
    """Per-core VMEM capacity; conservative fallback if the query fails."""
    try:
        info = pltpu.get_tpu_info()
        cap = int(getattr(info, "vmem_capacity_bytes", 0))
        if cap > 0:
            return cap
    except Exception:
        pass
    return 64 << 20  # v7x per-TC VMEM: safe lower bound for every generation


def _pick_pixel_tile(npix, batch, cin, cmid, cout, x_itemsize, out_itemsize,
                     tmax=8192):
    """Pick the pixel-lane tile TN and the scoped-VMEM limit to request."""
    cap = _vmem_capacity_bytes()
    # ~64 MiB of the 128 MiB on v5e/v6e; ~40 MiB of the 64 MiB per-TC on v7x.
    budget = min(64 << 20, int(cap * 0.625))

    # (sublane, lane) padded footprints: f32 tiles quantise to (8,128),
    # 2-byte dtypes to (16,128).
    sub_x = max(8, 32 // x_itemsize)
    sub_o = max(8, 32 // out_itemsize)
    cin_p = _round_up(cin, sub_x)
    cmid_p = _round_up(cmid, 8)          # intermediate h is f32
    cout_p = _round_up(cout, sub_o)

    # Resident weights/biases.  Counted x2 (double-buffered) so the budget is
    # safe even if single-buffering (Buffered(1)) is not honoured; lane dim
    # pads to 128.
    wbytes = 2 * x_itemsize * (cmid_p * _round_up(cin, 128) + cmid_p * 128 +
                               cout_p * _round_up(cmid, 128) + cout_p * 128)

    headroom = 2 << 20                   # compiler scratch / misc
    tile_budget = max(0, budget - wbytes - headroom)

    # Per-pixel-column bytes: double-buffered x and out tiles plus f32
    # intermediates (h and the pre-cast second-matmul result).
    per_lane = (2 * x_itemsize * cin_p + 2 * out_itemsize * cout_p
                + 4 * (cmid_p + cout_p))
    tn = max(128, (tile_budget // per_lane) // 128 * 128)
    tn = int(min(tmax, tn))

    if npix <= tn:
        tn = npix                        # single full block (layout-legal)
    elif npix % 128 == 0:
        # Largest multiple of 128 that divides npix and fits the budget:
        # no ragged / masked trailing block.
        units = npix // 128
        d = min(tn // 128, units)
        while d > 1 and units % d:
            d -= 1
        tn = d * 128
    # else: keep the multiple-of-128 tn; Pallas masks the trailing block.

    # v7x megacore: keep >= 2 grid points so both TensorCores get work
    # (costs only ~0.35 us extra step overhead on 1-TC chips).
    if batch * (-(-npix // tn)) < 2 and npix >= 256:
        tn = npix // 2 if npix % 256 == 0 else _round_up(npix // 2, 128)

    # Scoped-VMEM limit to communicate to the compiler (v5e's default scoped
    # limit is only 16 MiB).
    tn_p = _round_up(tn, 128)
    footprint = (2 * x_itemsize * cin_p * tn_p
                 + 2 * out_itemsize * cout_p * tn_p
                 + 4 * (cmid_p + cout_p) * tn_p
                 + wbytes + headroom)
    vmem_limit = int(min(int(cap * 0.9), max(budget, footprint)))
    return tn, vmem_limit


def _make_mlp_kernel(approximate_gelu):
    def kernel(x_ref, w1t_ref, b1_ref, w2t_ref, b2_ref, o_ref):
        # x_ref:   (Cin,  TN)  channels on sublanes, pixels on lanes
        # w1t_ref: (Cmid, Cin), b1_ref: (Cmid, 1)
        # w2t_ref: (Cout, Cmid), b2_ref: (Cout, 1)
        # o_ref:   (Cout, TN)
        x = x_ref[...]
        h = jnp.dot(w1t_ref[...], x, preferred_element_type=jnp.float32)
        h = h + b1_ref[...]
        if approximate_gelu:
            # tanh approximation runs on the EUP (separate bundle slot).
            h = jax.nn.gelu(h, approximate=True)
        else:
            # Exact erf GELU (torch F.gelu default) in f32.
            h = 0.5 * h * (1.0 + lax.erf(h * _INV_SQRT2))
        y = jnp.dot(w2t_ref[...], h.astype(w2t_ref.dtype),
                    preferred_element_type=jnp.float32)
        y = y + b2_ref[...]
        o_ref[...] = y.astype(o_ref.dtype)
    return kernel


def _resident_spec(shape, single_buffer):
    """Grid-invariant (constant-index) block; single-buffer when supported."""
    idx = lambda bi, j: (0, 0)
    if single_buffer:
        try:
            return pl.BlockSpec(shape, idx, pipeline_mode=pl.Buffered(1))
        except TypeError:
            pass
    return pl.BlockSpec(shape, idx)


def _build_mlp_call(b, cin, cmid, cout, npix, tn, out_dtype, vmem_limit,
                    approximate_gelu, single_buffer_weights):
    n_tiles = pl.cdiv(npix, tn)
    return pl.pallas_call(
        _make_mlp_kernel(approximate_gelu),
        out_shape=jax.ShapeDtypeStruct((b, cout, npix), out_dtype),
        grid_spec=pltpu.PrefetchScalarGridSpec(
            num_scalar_prefetch=0,
            grid=(b, n_tiles),
            in_specs=[
                pl.BlockSpec((None, cin, tn), lambda bi, j: (bi, 0, j)),
                _resident_spec((cmid, cin), single_buffer_weights),
                _resident_spec((cmid, 1), single_buffer_weights),
                _resident_spec((cout, cmid), single_buffer_weights),
                _resident_spec((cout, 1), single_buffer_weights),
            ],
            out_specs=pl.BlockSpec((None, cout, tn), lambda bi, j: (bi, 0, j)),
        ),
        compiler_params=pltpu.CompilerParams(
            dimension_semantics=("parallel", "parallel"),
            vmem_limit_bytes=int(vmem_limit)),
    )


def mlp_forward(x_nchw, params, approximate_gelu=False):
    """Full forward: NCHW in, NCHW out (matches the PyTorch MLP)."""
    w1, b1, w2, b2 = params              # w1: (Cin, Cmid), w2: (Cmid, Cout)
    b, cin, h, w = x_nchw.shape
    cmid = w1.shape[1]
    cout = w2.shape[1]
    npix = h * w

    # NCHW -> (B, Cin, H*W): free reshape, no transpose, no extra HBM pass.
    x3d = x_nchw.reshape(b, cin, npix)

    # Tiny weight reshapes done once outside the kernel.
    w1t = jnp.transpose(w1)              # (Cmid, Cin)
    w2t = jnp.transpose(w2)              # (Cout, Cmid)
    b1c = b1.reshape(cmid, 1)
    b2c = b2.reshape(cout, 1)

    itemsize = jnp.dtype(x_nchw.dtype).itemsize
    tn, vmem_limit = _pick_pixel_tile(npix, b, cin, cmid, cout,
                                      itemsize, itemsize)

    # Note: a K-tiling grid axis (accumulator + pl.when init/finalize) is only
    # worth adding when Cin/Cmid are large enough that the resident w1t block
    # itself threatens VMEM; for typical MLP channel counts it is unnecessary.
    args = (x3d, w1t, b1c, w2t, b2c)
    try:
        y3d = _build_mlp_call(b, cin, cmid, cout, npix, tn, x_nchw.dtype,
                              vmem_limit, approximate_gelu, True)(*args)
    except Exception:
        # Fallback if single-buffered resident weights (Buffered(1)) are not
        # supported by this Pallas pipeliner; layout/tiling is identical.
        y3d = _build_mlp_call(b, cin, cmid, cout, npix, tn, x_nchw.dtype,
                              vmem_limit, approximate_gelu, False)(*args)

    # (B, Cout, H*W) -> NCHW: free reshape.
    return y3d.reshape(b, cout, h, w)


def init_params(key, in_channels, mid_channels, out_channels, dtype=jnp.float32):
    """Deterministic init mimicking nn.Conv2d default (kaiming-uniform-ish).

    PyTorch Conv2d weight shape is (out, in, 1, 1); we store the equivalent
    matmul weight as (in, out) so that y = x @ W + b.
    """
    k1, k2, k3, k4 = jax.random.split(key, 4)
    bound1 = 1.0 / jnp.sqrt(in_channels)
    bound2 = 1.0 / jnp.sqrt(mid_channels)
    w1 = jax.random.uniform(k1, (in_channels, mid_channels), dtype,
                            minval=-bound1, maxval=bound1)
    b1 = jax.random.uniform(k2, (mid_channels,), dtype,
                            minval=-bound1, maxval=bound1)
    w2 = jax.random.uniform(k3, (mid_channels, out_channels), dtype,
                            minval=-bound2, maxval=bound2)
    b2 = jax.random.uniform(k4, (out_channels,), dtype,
                            minval=-bound2, maxval=bound2)
    return w1, b1, w2, b2


def mlp_forward_ref(x_nchw, params):
    """Pure-JAX reference for the same forward pass."""
    w1, b1, w2, b2 = params
    x = jnp.transpose(x_nchw, (0, 2, 3, 1))            # NHWC
    h = x @ w1 + b1
    h = 0.5 * h * (1.0 + lax.erf(h * _INV_SQRT2))      # exact GELU
    y = h @ w2 + b2
    return jnp.transpose(y, (0, 3, 1, 2))              # NCHW


if __name__ == "__main__":
    key = jax.random.PRNGKey(0)
    k_x, k_p = jax.random.split(key)

    B, Cin, Cmid, Cout, H, W = 2, 4, 32, 4, 16, 16
    x = jax.random.normal(k_x, (B, Cin, H, W), jnp.float32)
    params = init_params(k_p, Cin, Cmid, Cout)

    y = mlp_forward(x, params)
    y = jax.block_until_ready(y)

    y_ref = mlp_forward_ref(x, params)
    assert y.shape == (B, Cout, H, W), y.shape
    assert jnp.allclose(y, y_ref, atol=1e-5, rtol=1e-5), (
        float(jnp.max(jnp.abs(y - y_ref))))

    print("KERNEL_OK")
</pallas_src>

<mosaic_0001>
module attributes {stable_mosaic.version = 11 : i64} {
  func.func @kernel(%arg0: i32, %arg1: i32, %arg2: memref<1x4x256xf32, #tpu.memory_space<vmem>>, %arg3: memref<32x4xf32, #tpu.memory_space<vmem>>, %arg4: memref<32x1xf32, #tpu.memory_space<vmem>>, %arg5: memref<4x32xf32, #tpu.memory_space<vmem>>, %arg6: memref<4x1xf32, #tpu.memory_space<vmem>>, %arg7: memref<1x4x256xf32, #tpu.memory_space<vmem>>) attributes {dimension_semantics = [#tpu.dimension_semantics<parallel>, #tpu.dimension_semantics<parallel>], iteration_bounds = array<i64: 2, 1>, scalar_prefetch = 0 : i64, scratch_operands = 0 : i64, tpu.core_type = #tpu.core_type<tc>, window_params = [{transform_indices = @transform_0, window_bounds = array<i64: 1, 4, 256>}, {pipeline_mode = #tpu.pipeline_mode<synchronous>, transform_indices = @transform_1, window_bounds = array<i64: 32, 4>}, {pipeline_mode = #tpu.pipeline_mode<synchronous>, transform_indices = @transform_2, window_bounds = array<i64: 32, 1>}, {pipeline_mode = #tpu.pipeline_mode<synchronous>, transform_indices = @transform_3, window_bounds = array<i64: 4, 32>}, {pipeline_mode = #tpu.pipeline_mode<synchronous>, transform_indices = @transform_4, window_bounds = array<i64: 4, 1>}, {transform_indices = @transform_5, window_bounds = array<i64: 1, 4, 256>}]} {
    %c0 = arith.constant 0 : index
    %c0_0 = arith.constant 0 : index
    %c0_1 = arith.constant 0 : index
    %0 = vector.load %arg2[%c0, %c0_0, %c0_1] : memref<1x4x256xf32, #tpu.memory_space<vmem>>, vector<1x4x256xf32>
    %1 = vector.shape_cast %0 : vector<1x4x256xf32> to vector<4x256xf32>
    %c0_2 = arith.constant 0 : index
    %c0_3 = arith.constant 0 : index
    %2 = vector.load %arg3[%c0_2, %c0_3] : memref<32x4xf32, #tpu.memory_space<vmem>>, vector<32x4xf32>
    %cst = arith.constant dense<0.000000e+00> : vector<32x256xf32>
    %3 = tpu.matmul %2, %1, %cst {dimension_numbers = #tpu.dot_dimension_numbers<[1], [0], [0], [1], [0, 0, 1, 1], [], []>} : vector<32x4xf32>, vector<4x256xf32>, vector<32x256xf32> -> vector<32x256xf32>
    %c0_4 = arith.constant 0 : index
    %c0_5 = arith.constant 0 : index
    %4 = vector.load %arg4[%c0_4, %c0_5] : memref<32x1xf32, #tpu.memory_space<vmem>>, vector<32x1xf32>
    %5 = vector.broadcast %4 : vector<32x1xf32> to vector<32x256xf32>
    %6 = arith.addf %3, %5 : vector<32x256xf32>
    %cst_6 = arith.constant 5.000000e-01 : f32
    %7 = vector.broadcast %cst_6 : f32 to vector<32x256xf32>
    %8 = arith.mulf %7, %6 : vector<32x256xf32>
    %cst_7 = arith.constant 0.707106769 : f32
    %9 = vector.broadcast %cst_7 : f32 to vector<32x256xf32>
    %10 = arith.mulf %6, %9 : vector<32x256xf32>
    %11 = math.erf %10 : vector<32x256xf32>
    %cst_8 = arith.constant 1.000000e+00 : f32
    %12 = vector.broadcast %cst_8 : f32 to vector<32x256xf32>
    %13 = arith.addf %12, %11 : vector<32x256xf32>
    %14 = arith.mulf %8, %13 : vector<32x256xf32>
    %c0_9 = arith.constant 0 : index
    %c0_10 = arith.constant 0 : index
    %15 = vector.load %arg5[%c0_9, %c0_10] : memref<4x32xf32, #tpu.memory_space<vmem>>, vector<4x32xf32>
    %cst_11 = arith.constant dense<0.000000e+00> : vector<4x256xf32>
    %16 = tpu.matmul %15, %14, %cst_11 {dimension_numbers = #tpu.dot_dimension_numbers<[1], [0], [0], [1], [0, 0, 1, 1], [], []>} : vector<4x32xf32>, vector<32x256xf32>, vector<4x256xf32> -> vector<4x256xf32>
    %c0_12 = arith.constant 0 : index
    %c0_13 = arith.constant 0 : index
    %17 = vector.load %arg6[%c0_12, %c0_13] : memref<4x1xf32, #tpu.memory_space<vmem>>, vector<4x1xf32>
    %18 = vector.broadcast %17 : vector<4x1xf32> to vector<4x256xf32>
    %19 = arith.addf %16, %18 : vector<4x256xf32>
    %c0_14 = arith.constant 0 : index
    %c0_15 = arith.constant 0 : index
    %c0_16 = arith.constant 0 : index
    %20 = vector.load %arg7[%c0_14, %c0_15, %c0_16] : memref<1x4x256xf32, #tpu.memory_space<vmem>>, vector<1x4x256xf32>
    %21 = vector.shape_cast %20 : vector<1x4x256xf32> to vector<4x256xf32>
    %22 = vector.shape_cast %19 : vector<4x256xf32> to vector<1x4x256xf32>
    tpu.vector_store %arg7[%c0_14, %c0_15, %c0_16], %22 {strides = array<i32>} : memref<1x4x256xf32, #tpu.memory_space<vmem>>, vector<1x4x256xf32>,
    return
  }
  func.func @transform_0(%arg0: i32, %arg1: i32) -> (i32, i32, i32) {
    %c0_i32 = arith.constant 0 : i32
    %c0_i32_0 = arith.constant 0 : i32
    return %arg0, %c0_i32, %arg1 : i32, i32, i32
  }
  func.func @transform_1(%arg0: i32, %arg1: i32) -> (i32, i32) {
    %c0_i32 = arith.constant 0 : i32
    %c0_i32_0 = arith.constant 0 : i32
    %c0_i32_1 = arith.constant 0 : i32
    return %c0_i32, %c0_i32_0 : i32, i32
  }
  func.func @transform_2(%arg0: i32, %arg1: i32) -> (i32, i32) {
    %c0_i32 = arith.constant 0 : i32
    %c0_i32_0 = arith.constant 0 : i32
    %c0_i32_1 = arith.constant 0 : i32
    return %c0_i32, %c0_i32_0 : i32, i32
  }
  func.func @transform_3(%arg0: i32, %arg1: i32) -> (i32, i32) {
    %c0_i32 = arith.constant 0 : i32
    %c0_i32_0 = arith.constant 0 : i32
    %c0_i32_1 = arith.constant 0 : i32
    return %c0_i32, %c0_i32_0 : i32, i32
  }
  func.func @transform_4(%arg0: i32, %arg1: i32) -> (i32, i32) {
    %c0_i32 = arith.constant 0 : i32
    %c0_i32_0 = arith.constant 0 : i32
    %c0_i32_1 = arith.constant 0 : i32
    return %c0_i32, %c0_i32_0 : i32, i32
  }
  func.func @transform_5(%arg0: i32, %arg1: i32) -> (i32, i32, i32) {
    %c0_i32 = arith.constant 0 : i32
    %c0_i32_0 = arith.constant 0 : i32
    return %arg0, %c0_i32, %arg1 : i32, i32, i32
  }
}

module attributes {stable_mosaic.version = 11 : i64} {
  func.func @kernel(%arg0: i32, %arg1: i32, %arg2: memref<1x4x256xf32, #tpu.memory_space<vmem>>, %arg3: memref<32x4xf32, #tpu.memory_space<vmem>>, %arg4: memref<32x1xf32, #tpu.memory_space<vmem>>, %arg5: memref<4x32xf32, #tpu.memory_space<vmem>>, %arg6: memref<4x1xf32, #tpu.memory_space<vmem>>, %arg7: memref<1x4x256xf32, #tpu.memory_space<vmem>>) attributes {dimension_semantics = [#tpu.dimension_semantics<parallel>, #tpu.dimension_semantics<parallel>], iteration_bounds = array<i64: 2, 1>, scalar_prefetch = 0 : i64, scratch_operands = 0 : i64, tpu.core_type = #tpu.core_type<tc>, window_params = [{transform_indices = @transform_0, window_bounds = array<i64: 1, 4, 256>}, {pipeline_mode = #tpu.pipeline_mode<synchronous>, transform_indices = @transform_1, window_bounds = array<i64: 32, 4>}, {pipeline_mode = #tpu.pipeline_mode<synchronous>, transform_indices = @transform_2, window_bounds = array<i64: 32, 1>}, {pipeline_mode = #tpu.pipeline_mode<synchronous>, transform_indices = @transform_3, window_bounds = array<i64: 4, 32>}, {pipeline_mode = #tpu.pipeline_mode<synchronous>, transform_indices = @transform_4, window_bounds = array<i64: 4, 1>}, {transform_indices = @transform_5, window_bounds = array<i64: 1, 4, 256>}]} {
    %c0 = arith.constant 0 : index
    %c0_0 = arith.constant 0 : index
    %c0_1 = arith.constant 0 : index
    %0 = vector.load %arg2[%c0, %c0_0, %c0_1] : memref<1x4x256xf32, #tpu.memory_space<vmem>>, vector<1x4x256xf32>
    %1 = vector.shape_cast %0 : vector<1x4x256xf32> to vector<4x256xf32>
    %c0_2 = arith.constant 0 : index
    %c0_3 = arith.constant 0 : index
    %2 = vector.load %arg3[%c0_2, %c0_3] : memref<32x4xf32, #tpu.memory_space<vmem>>, vector<32x4xf32>
    %cst = arith.constant dense<0.000000e+00> : vector<32x256xf32>
    %3 = tpu.matmul %2, %1, %cst {dimension_numbers = #tpu.dot_dimension_numbers<[1], [0], [0], [1], [0, 0, 1, 1], [], []>} : vector<32x4xf32>, vector<4x256xf32>, vector<32x256xf32> -> vector<32x256xf32>
    %c0_4 = arith.constant 0 : index
    %c0_5 = arith.constant 0 : index
    %4 = vector.load %arg4[%c0_4, %c0_5] : memref<32x1xf32, #tpu.memory_space<vmem>>, vector<32x1xf32>
    %5 = vector.broadcast %4 : vector<32x1xf32> to vector<32x256xf32>
    %6 = arith.addf %3, %5 : vector<32x256xf32>
    %cst_6 = arith.constant 5.000000e-01 : f32
    %7 = vector.broadcast %cst_6 : f32 to vector<32x256xf32>
    %8 = arith.mulf %7, %6 : vector<32x256xf32>
    %cst_7 = arith.constant 0.707106769 : f32
    %9 = vector.broadcast %cst_7 : f32 to vector<32x256xf32>
    %10 = arith.mulf %6, %9 : vector<32x256xf32>
    %11 = math.erf %10 : vector<32x256xf32>
    %cst_8 = arith.constant 1.000000e+00 : f32
    %12 = vector.broadcast %cst_8 : f32 to vector<32x256xf32>
    %13 = arith.addf %12, %11 : vector<32x256xf32>
    %14 = arith.mulf %8, %13 : vector<32x256xf32>
    %c0_9 = arith.constant 0 : index
    %c0_10 = arith.constant 0 : index
    %15 = vector.load %arg5[%c0_9, %c0_10] : memref<4x32xf32, #tpu.memory_space<vmem>>, vector<4x32xf32>
    %cst_11 = arith.constant dense<0.000000e+00> : vector<4x256xf32>
    %16 = tpu.matmul %15, %14, %cst_11 {dimension_numbers = #tpu.dot_dimension_numbers<[1], [0], [0], [1], [0, 0, 1, 1], [], []>} : vector<4x32xf32>, vector<32x256xf32>, vector<4x256xf32> -> vector<4x256xf32>
    %c0_12 = arith.constant 0 : index
    %c0_13 = arith.constant 0 : index
    %17 = vector.load %arg6[%c0_12, %c0_13] : memref<4x1xf32, #tpu.memory_space<vmem>>, vector<4x1xf32>
    %18 = vector.broadcast %17 : vector<4x1xf32> to vector<4x256xf32>
    %19 = arith.addf %16, %18 : vector<4x256xf32>
    %c0_14 = arith.constant 0 : index
    %c0_15 = arith.constant 0 : index
    %c0_16 = arith.constant 0 : index
    %20 = vector.load %arg7[%c0_14, %c0_15, %c0_16] : memref<1x4x256xf32, #tpu.memory_space<vmem>>, vector<1x4x256xf32>
    %21 = vector.shape_cast %20 : vector<1x4x256xf32> to vector<4x256xf32>
    %22 = vector.shape_cast %19 : vector<4x256xf32> to vector<1x4x256xf32>
    tpu.vector_store %arg7[%c0_14, %c0_15, %c0_16], %22 {strides = array<i32>} : memref<1x4x256xf32, #tpu.memory_space<vmem>>, vector<1x4x256xf32>,
    return
  }
  func.func @transform_0(%arg0: i32, %arg1: i32) -> (i32, i32, i32) {
    %c0_i32 = arith.constant 0 : i32
    %c0_i32_0 = arith.constant 0 : i32
    return %arg0, %c0_i32, %arg1 : i32, i32, i32
  }
  func.func @transform_1(%arg0: i32, %arg1: i32) -> (i32, i32) {
    %c0_i32 = arith.constant 0 : i32
    %c0_i32_0 = arith.constant 0 : i32
    %c0_i32_1 = arith.constant 0 : i32
    return %c0_i32, %c0_i32_0 : i32, i32
  }
  func.func @transform_2(%arg0: i32, %arg1: i32) -> (i32, i32) {
    %c0_i32 = arith.constant 0 : i32
    %c0_i32_0 = arith.constant 0 : i32
    %c0_i32_1 = arith.constant 0 : i32
    return %c0_i32, %c0_i32_0 : i32, i32
  }
  func.func @transform_3(%arg0: i32, %arg1: i32) -> (i32, i32) {
    %c0_i32 = arith.constant 0 : i32
    %c0_i32_0 = arith.constant 0 : i32
    %c0_i32_1 = arith.constant 0 : i32
    return %c0_i32, %c0_i32_0 : i32, i32
  }
  func.func @transform_4(%arg0: i32, %arg1: i32) -> (i32, i32) {
    %c0_i32 = arith.constant 0 : i32
    %c0_i32_0 = arith.constant 0 : i32
    %c0_i32_1 = arith.constant 0 : i32
    return %c0_i32, %c0_i32_0 : i32, i32
  }
  func.func @transform_5(%arg0: i32, %arg1: i32) -> (i32, i32, i32) {
    %c0_i32 = arith.constant 0 : i32
    %c0_i32_0 = arith.constant 0 : i32
    return %arg0, %c0_i32, %arg1 : i32, i32, i32
  }
}

</mosaic_0001>

<bundles_post_ra>
// kernel: tpu_custom_call.1
= control target key start
LH: loop header
LB: loop body
LE: loop exit
PB: predicated region body
PF: predicated region fallthrough
CT: control target
= control target key end

     0   :  { %10 = vsyncpa [#allocation3], 0  ;;  %s950_s0 = inlined_call_operand.vmem [shape: f32[2,4,256], index: 0, kind: input, shape index: {}]   ;;  %s951_s1 = inlined_call_operand.vmem [shape: f32[32,4], index: 1, kind: input, shape index: {}]   ;;  %s952_s2 = inlined_call_operand.vmem [shape: f32[32,1], index: 2, kind: input, shape index: {}]   ;;  %s953_s3 = inlined_call_operand.vmem [shape: f32[4,32], index: 3, kind: input, shape index: {}]   ;;  %s954_s4 = inlined_call_operand.vmem [shape: f32[4,1], index: 4, kind: input, shape index: {}]   ;;  %s955_s5 = inlined_call_operand.hbm [shape: f32[2,4,256], index: 5, kind: output, shape index: {}]  }
   0x1   :  { %12 = vsyncpa [#allocation3 + $0x1], 0  ;;  %s821_s18 = smov 0   ;;  %s823_s19 = smov 0  }
   0x2   :  { %s825_s20 = smov 0   ;;  %s827_s21 = smov 0  }
   0x3   :  { %s829_s22 = smov 0   ;;  %s831_s23 = smov 0  }
   0x4 LB: > { %s612_s24 = sadd.s32 4294967295, %s786_s23   ;;  %s613_s25 = sadd.s32 4294967294, %s786_s23   ;;  %s786_s23 = sphi %s831_s23, %s18_s23   ;;  %s782_s22 = sphi %s829_s22, %s962_s22   ;;  %s778_s21 = sphi %s827_s21, %s961_s21   ;;  %s774_s20 = sphi %s825_s20, %s960_s20   ;;  %s770_s19 = sphi %s823_s19, %s959_s19   ;;  %s766_s18 = sphi %s821_s18, %s958_s18  }
   0x5   : > { %s30_s26 = sadd.s32 1, %s782_s22  ;;  %s151_s27 = sadd.s32 1, %s774_s20 }
   0x6   : > { %p32_p0 = scmp.ge.s32.totalorder %s30_s26, 2  ;;  %p161_p1 = scmp.ne.s32.totalorder %s774_s20, %s770_s19 }
   0x7   : > { %p162_p2 = scmp.eq.s32.totalorder %s612_s24, 1  ;;  %p167_p3 = scmp.ne.s32.totalorder %s770_s19, %s766_s18 }
   0x8   : > { %s964_s26 = smov (%p32_p0, %s30_s26), 0  ;;  %p168_p5 = scmp.eq.s32.totalorder %s613_s25, 1 }
   0x9   : > { %p861_p4 = por %p162_p2, %p161_p1  ;;  %s146_s29 = ssub.s32 %s782_s22, %s964_s26 }
   0xa   : > { %p616_p6 = scmp.ge.s32.totalorder %s786_s23, 1  ;;  %p149_p7 = scmp.eq.s32.totalorder %s146_s29, 0 }
   0xb   : > { %p868_p8 = por %p168_p5, %p167_p3  ;;  %p211_p9 = scmp.lt.s32.totalorder %s786_s23, 3 }
   0xc   : > { %s874_s6 = scalar_select %p149_p7, %s774_s20, %s151_s27  }
   0xd   : > { %p212_p10 = pnand %p616_p6, %p211_p9 }
   0xe   : > { %p244_p11 = scmp.lt.s32.totalorder (!%p212_p10), %s778_s21, 1  ;;  %s240_s17 = sand.u32 (!%p212_p10), 1, %s770_s19  }
   0xf   : > { %215 = sbr.rel (%p212_p10) target bundleno = 479 (0x1df), region = 40  ;;  %s617_s24 = sshll.u32 (!%p212_p10), %s240_s17, 3 }
  0x10   : > { %s242_s27 = scalar_lea.vmem (!%p212_p10), [#allocation2], %s617_s24  ;;  %s520_s10 = scalar_lea.sflag (!%p212_p10), [#allocation3], %s240_s17 }
  0x11   : > { %s536_s29 = sshll.u32 (!%p212_p10), %s242_s27, 4  ;;  %s537_s29 = int_to_ptr.vmem [resolvable:$true] %s536_s29 }
  0x12   : > { %s710_s11 = scalar_lea.vmem (!%p212_p10), %s537_s29, 128 }
  0x13   : > { %p711_p12 = scmp.ne.s32.totalorder (!%p212_p10), %s537_s29, %s710_s11 }
  0x14   : > { %v788_v0 = vmov 0.0   ;;  %v260_v1 = vld [vmem:[%s952_s2 + $0x8] sm:$0xff]  ;;  %s245_s9 = scalar_select %p244_p11, %s778_s21, 1  ;;  %v789_v2 = vmov 0   ;;  %v262_v3 = vld [vmem:[%s952_s2 + $0x18] sm:$0xff]  ;;  %v259_v4 = vld [vmem:[%s952_s2] sm:$0xff] }
  0x15   : > { %367 = vmatprep.mubr.f32.mxu0 %v788_v0  ;;  %507 = vmatprep.mubr.f32.mxu1 %v788_v0  ;;  %v261_v5 = vld [vmem:[%s952_s2 + $0x10] sm:$0xff]  ;;  %vm298_vm0 = vcmask 1043456   ;;  %v255_v8 = vld [vmem:[%s951_s1] sm:$0xff]  ;;  %vm285_vm1 = vcmask 31744   ;;  %v256_v10 = vld [vmem:[%s951_s1 + $0x8] sm:$0xff]  ;;  %vm439_vm2 = vcmask 261120   ;;  %p712_p13 = pnand %p711_p12, %p861_p4 }
  0x16   : > { %692 = vset.pattern.permute.xlu1 %v789_v2  ;;  %691 = vset.pattern.permute.xlu0 %v789_v2  ;;  %s632_s12 = sshll.u32 %s245_s9, 3  ;;  %v433_v9 = vld [vmem:[%s954_s4] sm:$0xf]  ;;  %v257_v11 = vld [vmem:[%s951_s1 + $0x10] sm:$0xff]  ;;  %v258_v12 = vld [vmem:[%s951_s1 + $0x18] sm:$0xff] }
  0x17   : > { %270 = vperm.xlu1 %692, %v260_v1   ;;  %280 = vperm.xlu0 %691, %v262_v3   ;;  %s251_s25 = scalar_lea.vmem %s950_s0, %s632_s12  ;;  %p713_p0 = pneg %p712_p13 }
  0x18   : > { %v254_v6 = vld [vmem:[%s251_s25] sm:$0xff]  ;;  %s633_s25 = sshll.u32 %s778_s21, 7  ;;  %s790_s12 = smov [#allocation2]  }
  0x19   : > { %v284_v7 = vcombine.high %v254_v6, %v254_v6  ;;  %s534_s9 = scalar_lea.hbm %s955_s5, %s633_s25  ;;  %s714_s13 = sshll.u32 %s790_s12, 4  ;;  %s715_s13 = int_to_ptr.vmem [resolvable:$false] %s714_s13 }
  0x1a   : > { %s716_s21 = scalar_lea.vmem %s715_s13, 256  ;;  %p717_p1 = scmp.lt.s32.totalorder %s537_s29, %s715_s13 }
  0x1b   : > { %265 = vperm.xlu1 %692, %v259_v4   ;;  %275 = vperm.xlu0 %691, %v261_v5   ;;  %p718_p2 = scmp.lt.s32.totalorder %s716_s21, %s710_s11 }
  0x1c   : > { %620 = vmatprep.subr.msk.mxu0 %vm298_vm0, %v284_v7 }
  0x1d   : > { %621 = vmatpush1.msk.msra.mxu0 %vm298_vm0, %v254_v6  ;;  %p719_p3 = por %p718_p2, %p717_p1 }
  0x1e   : > { %622 = vmatmul.mubr.msk.f32.vlgmr.msra.gmra.mxu0 %vm285_vm1, %v255_v8 }
  0x1f   : > { %436 = vperm.xlu0 %691, %v433_v9   ;;  %373 = vmatprep.mubr.f32.mxu0 %v788_v0  ;;  %v432_v9 = vld [vmem:[%s953_s3] sm:$0xf]  ;;  %p720_p5 = pnand %p719_p3, %p713_p0 }
  0x22   : > { %623 = vmatmul.mubr.msk.f32.gmra.mxu0 %vm285_vm1, %v256_v10 }
  0x23   : > { %379 = vmatprep.mubr.f32.mxu0 %v788_v0 }
  0x26   : > { %624 = vmatmul.mubr.msk.f32.gmra.mxu0 %vm285_vm1, %v257_v11 }
  0x27   : > { %385 = vmatprep.mubr.f32.mxu0 %v788_v0 }
  0x2a   : > { %625 = vmatmul.mubr.msk.f32.gmra.mxu0 %vm285_vm1, %v258_v12 }
  0x92   : > { %v281_v14 = vpop.permute.xlu0 %280  ;;  %v271_v17 = vpop.permute.xlu1 %270 }
  0x96   : > { %v276_v20 = vpop.permute.xlu0 %275  ;;  %v266_v24 = vpop.permute.xlu1 %265 }
  0x9a   : > { %v437_v11 = vpop.permute.xlu0 %436 }
  0xde   : > { %v369_v13 = vpop.f32.mrf.mxu0 }
  0xdf   : > { %v370_v32 = vadd.f32 %v369_v13, %v266_v24 }
  0xe0   : > { %v371_v15 = vpop.f32.mrf.mxu0 }
  0xe1   : > { %v372_v29 = vadd.f32 %v371_v15, %v266_v24  ;;  %v400_v40 = vmul.f32 0.70710677, %v370_v32  ;;  %v392_v5 = vmul.f32 0.5, %v370_v32 }
  0xe2   : > { %v375_v16 = vpop.f32.mrf.mxu0 }
  0xe3   : > { %v376_v27 = vadd.f32 %v375_v16, %v271_v17  ;;  %v401_v38 = vmul.f32 0.70710677, %v372_v29  ;;  %v393_v3 = vmul.f32 0.5, %v372_v29 }
  0xe4   : > { %v377_v18 = vpop.f32.mrf.mxu0 }
  0xe5   : > { %v378_v19 = vadd.f32 %v377_v18, %v271_v17  ;;  %v402_v37 = vmul.f32 0.70710677, %v376_v27  ;;  %v394_v0 = vmul.f32 0.5, %v376_v27 }
  0xe6   : > { %v381_v21 = vpop.f32.mrf.mxu0 }
  0xe7   : > { %v382_v22 = vadd.f32 %v381_v21, %v276_v20  ;;  %v403_v25 = vmul.f32 0.70710677, %v378_v19  ;;  %v395_v61 = vmul.f32 0.5, %v378_v19 }
  0xe8   : > { %v383_v23 = vpop.f32.mrf.mxu0 }
  0xe9   : > { %v384_v26 = vadd.f32 %v383_v23, %v276_v20  ;;  %v404_v33 = vmul.f32 0.70710677, %v382_v22  ;;  %694 = verf.f32 %v403_v25  ;;  %v396_v58 = vmul.f32 0.5, %v382_v22 }
  0xea   : > { %v387_v28 = vpop.f32.mrf.mxu0 }
  0xeb   : > { %v405_v30 = vmul.f32 0.70710677, %v384_v26  ;;  %v388_v31 = vadd.f32 %v387_v28, %v281_v14  ;;  %v397_v55 = vmul.f32 0.5, %v384_v26 }
  0xec   : > { %v389_v34 = vpop.f32.mrf.mxu0 }
  0xed   : > { %v406_v35 = vmul.f32 0.70710677, %v388_v31  ;;  %v390_v36 = vadd.f32 %v389_v34, %v281_v14  ;;  %696 = verf.f32 %v405_v30  ;;  %v398_v52 = vmul.f32 0.5, %v388_v31 }
  0xef   : > { %698 = verf.f32 %v406_v35  ;;  %v407_v39 = vmul.f32 0.70710677, %v390_v36  ;;  %v399_v48 = vmul.f32 0.5, %v390_v36 }
  0xf0   : > { %700 = verf.f32 %v404_v33 }
  0xf1   : > { %702 = verf.f32 %v407_v39 }
  0xf2   : > { %704 = verf.f32 %v402_v37 }
  0xf3   : > { %706 = verf.f32 %v401_v38 }
  0xf4   : > { %708 = verf.f32 %v400_v40 }
  0xf6   : > { %v695_v41 = vpop.eup %694 }
  0xf7   : > { %v419_v57 = vadd.f32 1.0, %v695_v41 }
  0xf9   : > { %v427_v4 = vmul.f32 %v419_v57, %v395_v61 }
  0xfa   : > { %v697_v42 = vpop.eup %696 }
  0xfb   : > { %v421_v50 = vadd.f32 1.0, %v697_v42 }
  0xfc   : > { %v699_v43 = vpop.eup %698 }
  0xfd   : > { %v701_v44 = vpop.eup %700  ;;  %v422_v46 = vadd.f32 1.0, %v699_v43  ;;  %v429_v62 = vmul.f32 %v421_v50, %v397_v55 }
  0xfe   : > { %v703_v45 = vpop.eup %702  ;;  %v420_v53 = vadd.f32 1.0, %v701_v44 }
  0xff   : > { %v705_v47 = vpop.eup %704  ;;  %v423_v49 = vadd.f32 1.0, %v703_v45  ;;  %v430_v59 = vmul.f32 %v422_v46, %v398_v52 }
 0x100   : > { %v707_v51 = vpop.eup %706  ;;  %v418_v60 = vadd.f32 1.0, %v705_v47  ;;  %v428_v1 = vmul.f32 %v420_v53, %v396_v58 }
 0x101   : > { %v709_v54 = vpop.eup %708  ;;  %v431_v56 = vmul.f32 %v423_v49, %v399_v48  ;;  %v417_v63 = vadd.f32 1.0, %v707_v51 }
 0x102   : > { %v416_v2 = vadd.f32 1.0, %v709_v54  ;;  %v426_v6 = vmul.f32 %v418_v60, %v394_v0 }
 0x103   : > { %467 = vmatprep.subr.mxu1 %v431_v56  ;;  %v425_v7 = vmul.f32 %v417_v63, %v393_v3 }
 0x104   : > { %468 = vmatpush1.msra.mxu1 %v430_v59  ;;  %v424_v8 = vmul.f32 %v416_v2, %v392_v5 }
 0x105   : > { %469 = vmatprep.subr.mxu1 %v429_v62 }
 0x106   : > { %470 = vmatpush1.msra.mxu1 %v428_v1 }
 0x107   : > { %471 = vmatprep.subr.mxu1 %v427_v4 }
 0x108   : > { %472 = vmatpush1.msra.mxu1 %v426_v6 }
 0x109   : > { %473 = vmatprep.subr.mxu1 %v425_v7 }
 0x10a   : > { %474 = vmatpush1.msra.mxu1 %v424_v8 }
 0x10b   : > { %626 = vmatmul.mubr.msk.f32.vlgmr.msra.gmra.mxu1 %vm439_vm2, %v432_v9 }
 0x1cb   : > { %v509_v10 = vpop.f32.mrf.mxu1 }
 0x1cc   : > { %v510_v13 = vadd.f32 %v509_v10, %v437_v11 }
 0x1cd   : > { %v511_v12 = vpop.f32.mrf.mxu1 }
 0x1ce   : > { %v512_v14 = vadd.f32 %v511_v12, %v437_v11 }
 0x1d0   : > { %v516_v15 = vcombine.low %v510_v13, %v512_v14 }
 0x1d2   : > { %518 = vst [vmem:[%s242_s27] sm:$0xff] %v516_v15 }
 0x1d3   : > { %723 = shalt.err (!%p720_p5)
}
 0x1d4   : > { %s724_s14 = scalar_lea.hbm %s534_s9, 128  ;;  %s728_s17 = scalar_lea.hbm %s955_s5, 256 }
 0x1d5   : > { %p725_p6 = scmp.ne.s32.totalorder %s534_s9, %s724_s14  ;;  %p729_p10 = scmp.lt.s32.totalorder %s534_s9, %s955_s5 }
 0x1d6   : > { %p730_p11 = scmp.lt.s32.totalorder %s728_s17, %s724_s14 }
 0x1d7   : > { %p726_p7 = pnand %p725_p6, %p861_p4 }
 0x1d8   : > { %p731_p12 = por %p730_p11, %p729_p10 }
 0x1d9   : > { %p727_p9 = pneg %p726_p7 }
 0x1db   : > { %p732_p13 = pnand %p731_p12, %p727_p9 }
 0x1dd   : > { %735 = shalt.err (!%p732_p13)
}
 0x1de   : > { %634 = dma.vmem_to_hbm [thread:$0]  (%p861_p4), %s537_s29, 128, %s534_s9, %s520_s10  }
 0x1df PF: > { %p640_p0 = scmp.ge.s32.totalorder %s786_s23, 2  ;;  %s548_s27 = sand.u32 1, %s766_s18  }
 0x1e0   : > { %s549_s7 = scalar_lea.sflag [#allocation3], %s548_s27 }
 0x1e1   : > { %p637_p1 = pnand %p640_p0, %p868_p8 }
 0x1e3   : > { %p638_p2 = pneg %p637_p1 }
 0x1e5   : > { %761 = dma.done.wait (%p638_p2), %s549_s7, 128  }
 0x1e6   : > { %763 = vsyncadd (%p638_p2), %s549_s7, 4294967168  ;;  %s18_s23 = sadd.s32 1, %s786_s23   ;;  %s958_s18 = smov %s770_s19 }
 0x1e7   : > { %p15_p3 = scmp.ge.s32.totalorder %s18_s23, 4   ;;  %s959_s19 = smov %s774_s20 }
 0x1e8   : > { %s960_s20 = smov %s874_s6  ;;  %s961_s21 = smov %s782_s22 }
 0x1e9   : > { %s962_s22 = smov %s964_s26  ;;  %17 = sbr.rel (!%p15_p3) target bundleno = 4 (0x4), region = 75 }
 0x1ee   :  { %554 = vsyncpa [#allocation3], 1 }
 0x1ef   :  { %556 = vsyncpa [#allocation3 + $0x1], 1 }

// kernel: tpu_custom_call.1
= control target key start
LH: loop header
LB: loop body
LE: loop exit
PB: predicated region body
PF: predicated region fallthrough
CT: control target
= control target key end

     0   :  { %10 = vsyncpa [#allocation3], 0  ;;  %s950_s0 = inlined_call_operand.vmem [shape: f32[2,4,256], index: 0, kind: input, shape index: {}]   ;;  %s951_s1 = inlined_call_operand.vmem [shape: f32[32,4], index: 1, kind: input, shape index: {}]   ;;  %s952_s2 = inlined_call_operand.vmem [shape: f32[32,1], index: 2, kind: input, shape index: {}]   ;;  %s953_s3 = inlined_call_operand.vmem [shape: f32[4,32], index: 3, kind: input, shape index: {}]   ;;  %s954_s4 = inlined_call_operand.vmem [shape: f32[4,1], index: 4, kind: input, shape index: {}]   ;;  %s955_s5 = inlined_call_operand.hbm [shape: f32[2,4,256], index: 5, kind: output, shape index: {}]  }
   0x1   :  { %12 = vsyncpa [#allocation3 + $0x1], 0  ;;  %s821_s18 = smov 0   ;;  %s823_s19 = smov 0  }
   0x2   :  { %s825_s20 = smov 0   ;;  %s827_s21 = smov 0  }
   0x3   :  { %s829_s22 = smov 0   ;;  %s831_s23 = smov 0  }
   0x4 LB: > { %s612_s24 = sadd.s32 4294967295, %s786_s23   ;;  %s613_s25 = sadd.s32 4294967294, %s786_s23   ;;  %s786_s23 = sphi %s831_s23, %s18_s23   ;;  %s782_s22 = sphi %s829_s22, %s962_s22   ;;  %s778_s21 = sphi %s827_s21, %s961_s21   ;;  %s774_s20 = sphi %s825_s20, %s960_s20   ;;  %s770_s19 = sphi %s823_s19, %s959_s19   ;;  %s766_s18 = sphi %s821_s18, %s958_s18  }
   0x5   : > { %s30_s26 = sadd.s32 1, %s782_s22  ;;  %s151_s27 = sadd.s32 1, %s774_s20 }
   0x6   : > { %p32_p0 = scmp.ge.s32.totalorder %s30_s26, 2  ;;  %p161_p1 = scmp.ne.s32.totalorder %s774_s20, %s770_s19 }
   0x7   : > { %p162_p2 = scmp.eq.s32.totalorder %s612_s24, 1  ;;  %p167_p3 = scmp.ne.s32.totalorder %s770_s19, %s766_s18 }
   0x8   : > { %s964_s26 = smov (%p32_p0, %s30_s26), 0  ;;  %p168_p5 = scmp.eq.s32.totalorder %s613_s25, 1 }
   0x9   : > { %p861_p4 = por %p162_p2, %p161_p1  ;;  %s146_s29 = ssub.s32 %s782_s22, %s964_s26 }
   0xa   : > { %p616_p6 = scmp.ge.s32.totalorder %s786_s23, 1  ;;  %p149_p7 = scmp.eq.s32.totalorder %s146_s29, 0 }
   0xb   : > { %p868_p8 = por %p168_p5, %p167_p3  ;;  %p211_p9 = scmp.lt.s32.totalorder %s786_s23, 3 }
   0xc   : > { %s874_s6 = scalar_select %p149_p7, %s774_s20, %s151_s27  }
   0xd   : > { %p212_p10 = pnand %p616_p6, %p211_p9 }
   0xe   : > { %p244_p11 = scmp.lt.s32.totalorder (!%p212_p10), %s778_s21, 1  ;;  %s240_s17 = sand.u32 (!%p212_p10), 1, %s770_s19  }
   0xf   : > { %215 = sbr.rel (%p212_p10) target bundleno = 479 (0x1df), region = 40  ;;  %s617_s24 = sshll.u32 (!%p212_p10), %s240_s17, 3 }
  0x10   : > { %s242_s27 = scalar_lea.vmem (!%p212_p10), [#allocation2], %s617_s24  ;;  %s520_s10 = scalar_lea.sflag (!%p212_p10), [#allocation3], %s240_s17 }
  0x11   : > { %s536_s29 = sshll.u32 (!%p212_p10), %s242_s27, 4  ;;  %s537_s29 = int_to_ptr.vmem [resolvable:$true] %s536_s29 }
  0x12   : > { %s710_s11 = scalar_lea.vmem (!%p212_p10), %s537_s29, 128 }
  0x13   : > { %p711_p12 = scmp.ne.s32.totalorder (!%p212_p10), %s537_s29, %s710_s11 }
  0x14   : > { %v788_v0 = vmov 0.0   ;;  %v260_v1 = vld [vmem:[%s952_s2 + $0x8] sm:$0xff]  ;;  %s245_s9 = scalar_select %p244_p11, %s778_s21, 1  ;;  %v789_v2 = vmov 0   ;;  %v262_v3 = vld [vmem:[%s952_s2 + $0x18] sm:$0xff]  ;;  %v259_v4 = vld [vmem:[%s952_s2] sm:$0xff] }
  0x15   : > { %367 = vmatprep.mubr.f32.mxu0 %v788_v0  ;;  %507 = vmatprep.mubr.f32.mxu1 %v788_v0  ;;  %v261_v5 = vld [vmem:[%s952_s2 + $0x10] sm:$0xff]  ;;  %vm298_vm0 = vcmask 1043456   ;;  %v255_v8 = vld [vmem:[%s951_s1] sm:$0xff]  ;;  %vm285_vm1 = vcmask 31744   ;;  %v256_v10 = vld [vmem:[%s951_s1 + $0x8] sm:$0xff]  ;;  %vm439_vm2 = vcmask 261120   ;;  %p712_p13 = pnand %p711_p12, %p861_p4 }
  0x16   : > { %692 = vset.pattern.permute.xlu1 %v789_v2  ;;  %691 = vset.pattern.permute.xlu0 %v789_v2  ;;  %s632_s12 = sshll.u32 %s245_s9, 3  ;;  %v433_v9 = vld [vmem:[%s954_s4] sm:$0xf]  ;;  %v257_v11 = vld [vmem:[%s951_s1 + $0x10] sm:$0xff]  ;;  %v258_v12 = vld [vmem:[%s951_s1 + $0x18] sm:$0xff] }
  0x17   : > { %270 = vperm.xlu1 %692, %v260_v1   ;;  %280 = vperm.xlu0 %691, %v262_v3   ;;  %s251_s25 = scalar_lea.vmem %s950_s0, %s632_s12  ;;  %p713_p0 = pneg %p712_p13 }
  0x18   : > { %v254_v6 = vld [vmem:[%s251_s25] sm:$0xff]  ;;  %s633_s25 = sshll.u32 %s778_s21, 7  ;;  %s790_s12 = smov [#allocation2]  }
  0x19   : > { %v284_v7 = vcombine.high %v254_v6, %v254_v6  ;;  %s534_s9 = scalar_lea.hbm %s955_s5, %s633_s25  ;;  %s714_s13 = sshll.u32 %s790_s12, 4  ;;  %s715_s13 = int_to_ptr.vmem [resolvable:$false] %s714_s13 }
  0x1a   : > { %s716_s21 = scalar_lea.vmem %s715_s13, 256  ;;  %p717_p1 = scmp.lt.s32.totalorder %s537_s29, %s715_s13 }
  0x1b   : > { %265 = vperm.xlu1 %692, %v259_v4   ;;  %275 = vperm.xlu0 %691, %v261_v5   ;;  %p718_p2 = scmp.lt.s32.totalorder %s716_s21, %s710_s11 }
  0x1c   : > { %620 = vmatprep.subr.msk.mxu0 %vm298_vm0, %v284_v7 }
  0x1d   : > { %621 = vmatpush1.msk.msra.mxu0 %vm298_vm0, %v254_v6  ;;  %p719_p3 = por %p718_p2, %p717_p1 }
  0x1e   : > { %622 = vmatmul.mubr.msk.f32.vlgmr.msra.gmra.mxu0 %vm285_vm1, %v255_v8 }
  0x1f   : > { %436 = vperm.xlu0 %691, %v433_v9   ;;  %373 = vmatprep.mubr.f32.mxu0 %v788_v0  ;;  %v432_v9 = vld [vmem:[%s953_s3] sm:$0xf]  ;;  %p720_p5 = pnand %p719_p3, %p713_p0 }
  0x22   : > { %623 = vmatmul.mubr.msk.f32.gmra.mxu0 %vm285_vm1, %v256_v10 }
  0x23   : > { %379 = vmatprep.mubr.f32.mxu0 %v788_v0 }
  0x26   : > { %624 = vmatmul.mubr.msk.f32.gmra.mxu0 %vm285_vm1, %v257_v11 }
  0x27   : > { %385 = vmatprep.mubr.f32.mxu0 %v788_v0 }
  0x2a   : > { %625 = vmatmul.mubr.msk.f32.gmra.mxu0 %vm285_vm1, %v258_v12 }
  0x92   : > { %v281_v14 = vpop.permute.xlu0 %280  ;;  %v271_v17 = vpop.permute.xlu1 %270 }
  0x96   : > { %v276_v20 = vpop.permute.xlu0 %275  ;;  %v266_v24 = vpop.permute.xlu1 %265 }
  0x9a   : > { %v437_v11 = vpop.permute.xlu0 %436 }
  0xde   : > { %v369_v13 = vpop.f32.mrf.mxu0 }
  0xdf   : > { %v370_v32 = vadd.f32 %v369_v13, %v266_v24 }
  0xe0   : > { %v371_v15 = vpop.f32.mrf.mxu0 }
  0xe1   : > { %v372_v29 = vadd.f32 %v371_v15, %v266_v24  ;;  %v400_v40 = vmul.f32 0.70710677, %v370_v32  ;;  %v392_v5 = vmul.f32 0.5, %v370_v32 }
  0xe2   : > { %v375_v16 = vpop.f32.mrf.mxu0 }
  0xe3   : > { %v376_v27 = vadd.f32 %v375_v16, %v271_v17  ;;  %v401_v38 = vmul.f32 0.70710677, %v372_v29  ;;  %v393_v3 = vmul.f32 0.5, %v372_v29 }
  0xe4   : > { %v377_v18 = vpop.f32.mrf.mxu0 }
  0xe5   : > { %v378_v19 = vadd.f32 %v377_v18, %v271_v17  ;;  %v402_v37 = vmul.f32 0.70710677, %v376_v27  ;;  %v394_v0 = vmul.f32 0.5, %v376_v27 }
  0xe6   : > { %v381_v21 = vpop.f32.mrf.mxu0 }
  0xe7   : > { %v382_v22 = vadd.f32 %v381_v21, %v276_v20  ;;  %v403_v25 = vmul.f32 0.70710677, %v378_v19  ;;  %v395_v61 = vmul.f32 0.5, %v378_v19 }
  0xe8   : > { %v383_v23 = vpop.f32.mrf.mxu0 }
  0xe9   : > { %v384_v26 = vadd.f32 %v383_v23, %v276_v20  ;;  %v404_v33 = vmul.f32 0.70710677, %v382_v22  ;;  %694 = verf.f32 %v403_v25  ;;  %v396_v58 = vmul.f32 0.5, %v382_v22 }
  0xea   : > { %v387_v28 = vpop.f32.mrf.mxu0 }
  0xeb   : > { %v405_v30 = vmul.f32 0.70710677, %v384_v26  ;;  %v388_v31 = vadd.f32 %v387_v28, %v281_v14  ;;  %v397_v55 = vmul.f32 0.5, %v384_v26 }
  0xec   : > { %v389_v34 = vpop.f32.mrf.mxu0 }
  0xed   : > { %v406_v35 = vmul.f32 0.70710677, %v388_v31  ;;  %v390_v36 = vadd.f32 %v389_v34, %v281_v14  ;;  %696 = verf.f32 %v405_v30  ;;  %v398_v52 = vmul.f32 0.5, %v388_v31 }
  0xef   : > { %698 = verf.f32 %v406_v35  ;;  %v407_v39 = vmul.f32 0.70710677, %v390_v36  ;;  %v399_v48 = vmul.f32 0.5, %v390_v36 }
  0xf0   : > { %700 = verf.f32 %v404_v33 }
  0xf1   : > { %702 = verf.f32 %v407_v39 }
  0xf2   : > { %704 = verf.f32 %v402_v37 }
  0xf3   : > { %706 = verf.f32 %v401_v38 }
  0xf4   : > { %708 = verf.f32 %v400_v40 }
  0xf6   : > { %v695_v41 = vpop.eup %694 }
  0xf7   : > { %v419_v57 = vadd.f32 1.0, %v695_v41 }
  0xf9   : > { %v427_v4 = vmul.f32 %v419_v57, %v395_v61 }
  0xfa   : > { %v697_v42 = vpop.eup %696 }
  0xfb   : > { %v421_v50 = vadd.f32 1.0, %v697_v42 }
  0xfc   : > { %v699_v43 = vpop.eup %698 }
  0xfd   : > { %v701_v44 = vpop.eup %700  ;;  %v422_v46 = vadd.f32 1.0, %v699_v43  ;;  %v429_v62 = vmul.f32 %v421_v50, %v397_v55 }
  0xfe   : > { %v703_v45 = vpop.eup %702  ;;  %v420_v53 = vadd.f32 1.0, %v701_v44 }
  0xff   : > { %v705_v47 = vpop.eup %704  ;;  %v423_v49 = vadd.f32 1.0, %v703_v45  ;;  %v430_v59 = vmul.f32 %v422_v46, %v398_v52 }
 0x100   : > { %v707_v51 = vpop.eup %706  ;;  %v418_v60 = vadd.f32 1.0, %v705_v47  ;;  %v428_v1 = vmul.f32 %v420_v53, %v396_v58 }
 0x101   : > { %v709_v54 = vpop.eup %708  ;;  %v431_v56 = vmul.f32 %v423_v49, %v399_v48  ;;  %v417_v63 = vadd.f32 1.0, %v707_v51 }
 0x102   : > { %v416_v2 = vadd.f32 1.0, %v709_v54  ;;  %v426_v6 = vmul.f32 %v418_v60, %v394_v0 }
 0x103   : > { %467 = vmatprep.subr.mxu1 %v431_v56  ;;  %v425_v7 = vmul.f32 %v417_v63, %v393_v3 }
 0x104   : > { %468 = vmatpush1.msra.mxu1 %v430_v59  ;;  %v424_v8 = vmul.f32 %v416_v2, %v392_v5 }
 0x105   : > { %469 = vmatprep.subr.mxu1 %v429_v62 }
 0x106   : > { %470 = vmatpush1.msra.mxu1 %v428_v1 }
 0x107   : > { %471 = vmatprep.subr.mxu1 %v427_v4 }
 0x108   : > { %472 = vmatpush1.msra.mxu1 %v426_v6 }
 0x109   : > { %473 = vmatprep.subr.mxu1 %v425_v7 }
 0x10a   : > { %474 = vmatpush1.msra.mxu1 %v424_v8 }
 0x10b   : > { %626 = vmatmul.mubr.msk.f32.vlgmr.msra.gmra.mxu1 %vm439_vm2, %v432_v9 }
 0x1cb   : > { %v509_v10 = vpop.f32.mrf.mxu1 }
 0x1cc   : > { %v510_v13 = vadd.f32 %v509_v10, %v437_v11 }
 0x1cd   : > { %v511_v12 = vpop.f32.mrf.mxu1 }
 0x1ce   : > { %v512_v14 = vadd.f32 %v511_v12, %v437_v11 }
 0x1d0   : > { %v516_v15 = vcombine.low %v510_v13, %v512_v14 }
 0x1d2   : > { %518 = vst [vmem:[%s242_s27] sm:$0xff] %v516_v15 }
 0x1d3   : > { %723 = shalt.err (!%p720_p5)
}
 0x1d4   : > { %s724_s14 = scalar_lea.hbm %s534_s9, 128  ;;  %s728_s17 = scalar_lea.hbm %s955_s5, 256 }
 0x1d5   : > { %p725_p6 = scmp.ne.s32.totalorder %s534_s9, %s724_s14  ;;  %p729_p10 = scmp.lt.s32.totalorder %s534_s9, %s955_s5 }
 0x1d6   : > { %p730_p11 = scmp.lt.s32.totalorder %s728_s17, %s724_s14 }
 0x1d7   : > { %p726_p7 = pnand %p725_p6, %p861_p4 }
 0x1d8   : > { %p731_p12 = por %p730_p11, %p729_p10 }
 0x1d9   : > { %p727_p9 = pneg %p726_p7 }
 0x1db   : > { %p732_p13 = pnand %p731_p12, %p727_p9 }
 0x1dd   : > { %735 = shalt.err (!%p732_p13)
}
 0x1de   : > { %634 = dma.vmem_to_hbm [thread:$0]  (%p861_p4), %s537_s29, 128, %s534_s9, %s520_s10  }
 0x1df PF: > { %p640_p0 = scmp.ge.s32.totalorder %s786_s23, 2  ;;  %s548_s27 = sand.u32 1, %s766_s18  }
 0x1e0   : > { %s549_s7 = scalar_lea.sflag [#allocation3], %s548_s27 }
 0x1e1   : > { %p637_p1 = pnand %p640_p0, %p868_p8 }
 0x1e3   : > { %p638_p2 = pneg %p637_p1 }
 0x1e5   : > { %761 = dma.done.wait (%p638_p2), %s549_s7, 128  }
 0x1e6   : > { %763 = vsyncadd (%p638_p2), %s549_s7, 4294967168  ;;  %s18_s23 = sadd.s32 1, %s786_s23   ;;  %s958_s18 = smov %s770_s19 }
 0x1e7   : > { %p15_p3 = scmp.ge.s32.totalorder %s18_s23, 4   ;;  %s959_s19 = smov %s774_s20 }
 0x1e8   : > { %s960_s20 = smov %s874_s6  ;;  %s961_s21 = smov %s782_s22 }
 0x1e9   : > { %s962_s22 = smov %s964_s26  ;;  %17 = sbr.rel (!%p15_p3) target bundleno = 4 (0x4), region = 75 }
 0x1ee   :  { %554 = vsyncpa [#allocation3], 1 }
 0x1ef   :  { %556 = vsyncpa [#allocation3 + $0x1], 1 }

</bundles_post_ra>
